<compile_context>
chip_gen: v5e
topology: v5e:2x2
jax: 0.10.0
libtpu: 0.0.40
codegen_flags: <defaults>
</compile_context>

<pallas_src>
import functools
from collections import namedtuple

import jax
import jax.numpy as jnp
from jax.experimental import pallas as pl
from jax.experimental.pallas import tpu as pltpu

_LANE = 128


def _round_up(x, m):
    return ((x + m - 1) // m) * m


def _cdiv(a, b):
    return (a + b - 1) // b


def _sublane(dtype):
    size = jnp.dtype(dtype).itemsize
    if size >= 4:
        return 8
    if size == 2:
        return 16
    return 32


def _vmem_limit_bytes():
    cap = 64 * 1024 * 1024  # conservative (v7x per-TC) fallback
    try:
        info = pltpu.get_tpu_info()
        cap = int(getattr(info, "vmem_capacity_bytes", cap) or cap)
    except Exception:
        pass
    # leave headroom for compiler-internal scratch
    return max(32 * 1024 * 1024, cap - 16 * 1024 * 1024)


def _apply_activation(y, nl, fast_gelu):
    nl = nl.lower()
    if nl == "relu":
        return jnp.maximum(y, 0.0)
    if nl == "gelu":
        # nn.GELU() default is exact erf; approximate=True (tanh form) runs on the EUP
        # and is cheaper on v6e -- opt-in via fast_gelu.
        return jax.nn.gelu(y, approximate=fast_gelu)
    if nl == "elu":
        return jnp.where(y > 0, y, jnp.expm1(y))
    if nl == "silu":
        return y * jax.nn.sigmoid(y)
    if nl == "mish":
        return y * jnp.tanh(jax.nn.softplus(y))
    if nl == "leakyrelu":
        return jnp.where(y > 0, y, 0.01 * y)
    raise ValueError(f"unknown activation {nl}")


def _fc_act_kernel_acc(x_ref, w_ref, b_ref, o_ref, acc_ref, *, nl, fast_gelu):
    """grid = (M blocks, N blocks, K blocks); K innermost, f32 VMEM accumulator."""
    k = pl.program_id(2)

    @pl.when(k == 0)
    def _():
        acc_ref[...] = jnp.zeros_like(acc_ref)

    acc_ref[...] += jnp.dot(x_ref[...], w_ref[...],
                            preferred_element_type=jnp.float32)

    @pl.when(k == pl.num_programs(2) - 1)
    def _():
        y = acc_ref[...] + b_ref[...].astype(jnp.float32)
        o_ref[...] = _apply_activation(y, nl, fast_gelu).astype(o_ref.dtype)


def _fc_act_kernel_single(x_ref, w_ref, b_ref, o_ref, *, nl, fast_gelu):
    """grid = (M blocks, N blocks); whole K in one block -> no accumulator / branches."""
    y = jnp.dot(x_ref[...], w_ref[...], preferred_element_type=jnp.float32)
    y = y + b_ref[...].astype(jnp.float32)
    o_ref[...] = _apply_activation(y, nl, fast_gelu).astype(o_ref.dtype)


FcBlockParams = namedtuple("FcBlockParams", ["w_t", "b2d", "c_in", "c_out", "Kp", "tk"])


def prepare_fc_block_params(weight, bias, *, compute_dtype=None, max_tk=1024):
    """One-time parameter prep (amortize across forward calls).

    * transposes the PyTorch (out, in) weight to the canonical (K, N) MXU layout,
    * zero-pads the contracted K axis up to a lane-aligned tile multiple,
    * optionally casts to a compute dtype (e.g. bf16 in / f32 accumulate) -- opt-in,
      since it changes numerics relative to PyTorch f32 matmul.
    """
    c_out, c_in = weight.shape
    w = weight if compute_dtype is None else weight.astype(compute_dtype)
    w_t = w.T  # (c_in, c_out): canonical (K, N) layout for the MXU

    max_tk = max(_LANE, _round_up(max_tk, _LANE))
    Kp0 = _round_up(c_in, _LANE)
    nk = max(1, _cdiv(Kp0, max_tk))
    tk = _round_up(_cdiv(Kp0, nk), _LANE)
    Kp = tk * nk
    if Kp != c_in:
        w_t = jnp.pad(w_t, ((0, Kp - c_in), (0, 0)))
    b2d = bias.reshape(1, c_out)
    return FcBlockParams(w_t=w_t, b2d=b2d, c_in=c_in, c_out=c_out, Kp=Kp, tk=tk)


def fc_block_forward_prepared(x, params, *, NL="relu", fast_gelu=False, tm=None, tn=None):
    """Pallas fc_block.forward (BN=False) using pre-prepared params."""
    c_in, c_out, Kp, tk = params.c_in, params.c_out, params.Kp, params.tk
    assert x.shape[-1] == c_in
    lead = x.shape[:-1]
    x2d = x.reshape(-1, c_in)
    M = x2d.shape[0]
    out_dtype = x2d.dtype

    w_t = params.w_t
    if w_t.dtype != x2d.dtype:
        # NOTE: deviates from exact PyTorch numerics if this downcasts; prefer
        # prepare_fc_block_params(compute_dtype=...) so the cast is amortized once.
        w_t = w_t.astype(x2d.dtype)
    b2d = params.b2d

    # Only the contracted axis needs explicit zero padding (it feeds the accumulation).
    # M / N boundary blocks are handled by Pallas block masking -- no pad / slice there.
    if Kp != c_in:
        x2d = jnp.pad(x2d, ((0, 0), (0, Kp - c_in)))

    nk = Kp // tk
    sub = _sublane(x2d.dtype)
    Np = _round_up(c_out, _LANE)
    in_item = jnp.dtype(x2d.dtype).itemsize
    out_item = jnp.dtype(out_dtype).itemsize

    vmem_limit = _vmem_limit_bytes()
    plan_budget = int(vmem_limit * 0.7)  # tiles + double buffers must fit with headroom

    tm = 512 if tm is None else tm
    tm = max(sub, min(_round_up(tm, sub), _round_up(M, sub)))
    tn = 512 if tn is None else tn
    tn = max(_LANE, min(_round_up(tn, _LANE), Np))

    def vmem_usage(tm_, tn_):
        u = 2 * (tm_ * tk + tk * tn_ + tn_) * in_item   # x / w / bias double buffers
        u += 2 * tm_ * tn_ * out_item                   # output double buffer
        if nk > 1:
            u += tm_ * tn_ * 4                          # f32 accumulator scratch
        return u

    # Weight-resident variant: whole (Kp, Np) weight slab stays in VMEM, read from HBM once.
    if nk == 1 and tn < Np and vmem_usage(tm, Np) <= plan_budget:
        tn = Np

    # Shrink tiles until they (and their double buffers) fit the budget.
    while vmem_usage(tm, tn) > plan_budget:
        if tn >= tm and tn > _LANE:
            tn = max(_LANE, _round_up(tn // 2, _LANE))
        elif tm > sub:
            tm = max(sub, _round_up(tm // 2, sub))
        else:
            break

    # Megacore (v7x has 2 TCs): make sure the parallel grid has >= 2 blocks when possible.
    if _cdiv(M, tm) * _cdiv(c_out, tn) == 1:
        if Np >= 2 * _LANE:
            tn = _round_up(Np // 2, _LANE)
        elif M > sub:
            tm = _round_up(_cdiv(M, 2), sub)

    grid_m = _cdiv(M, tm)
    grid_n = _cdiv(c_out, tn)

    nl = NL.lower()
    transcendental = nl in ("gelu", "elu", "silu", "mish")
    cost = pl.CostEstimate(
        flops=2 * M * c_out * Kp,
        transcendentals=M * c_out if transcendental else 0,
        # account for re-streaming: x is re-read per N-block column, w per M-block row
        bytes_accessed=int(
            grid_m * grid_n * tm * Kp * in_item                      # x
            + grid_m * grid_n * Kp * tn * in_item                    # w
            + grid_m * grid_n * tn * jnp.dtype(b2d.dtype).itemsize   # bias
            + grid_m * grid_n * tm * tn * out_item                   # out
        ),
    )
    compiler_params = pltpu.CompilerParams(
        dimension_semantics=("parallel", "parallel") + (("arbitrary",) if nk > 1 else ()),
        vmem_limit_bytes=vmem_limit,
    )

    if nk == 1:
        kernel = functools.partial(_fc_act_kernel_single, nl=nl, fast_gelu=fast_gelu)
        grid = (grid_m, grid_n)
        in_specs = [
            pl.BlockSpec((tm, tk), lambda i, j: (i, 0)),   # x tile
            pl.BlockSpec((tk, tn), lambda i, j: (0, j)),   # weight tile, canonical (K, N)
            pl.BlockSpec((1, tn), lambda i, j: (0, j)),    # bias tile
        ]
        out_specs = pl.BlockSpec((tm, tn), lambda i, j: (i, j))
        scratch_shapes = []
    else:
        kernel = functools.partial(_fc_act_kernel_acc, nl=nl, fast_gelu=fast_gelu)
        grid = (grid_m, grid_n, nk)
        in_specs = [
            pl.BlockSpec((tm, tk), lambda i, j, k: (i, k)),
            pl.BlockSpec((tk, tn), lambda i, j, k: (k, j)),
            pl.BlockSpec((1, tn), lambda i, j, k: (0, j)),
        ]
        out_specs = pl.BlockSpec((tm, tn), lambda i, j, k: (i, j))
        scratch_shapes = [pltpu.VMEM((tm, tn), jnp.float32)]

    out = pl.pallas_call(
        kernel,
        out_shape=jax.ShapeDtypeStruct((M, c_out), out_dtype),  # exact shape: no wrapper slice
        grid_spec=pltpu.PrefetchScalarGridSpec(
            num_scalar_prefetch=0,
            grid=grid,
            in_specs=in_specs,
            out_specs=out_specs,
            scratch_shapes=scratch_shapes,
        ),
        compiler_params=compiler_params,
        cost_estimate=cost,
    )(x2d, w_t, b2d)

    return out.reshape(*lead, c_out)


def fc_block_forward(x, weight, bias, *, NL="relu", fast_gelu=False,
                     tm=None, tn=None, max_tk=1024):
    """Convenience path: prep params on the fly (prefer prepare_fc_block_params once
    + fc_block_forward_prepared when calling the same layer repeatedly)."""
    params = prepare_fc_block_params(weight, bias, max_tk=max_tk)
    return fc_block_forward_prepared(x, params, NL=NL, fast_gelu=fast_gelu, tm=tm, tn=tn)


def init_fc_block_params(key, channels_in, channels_out):
    """Deterministic init mirroring nn.Linear default (uniform +- 1/sqrt(fan_in))."""
    kw, kb = jax.random.split(key)
    bound = 1.0 / (channels_in ** 0.5)
    weight = jax.random.uniform(
        kw, (channels_out, channels_in), jnp.float32, minval=-bound, maxval=bound
    )
    bias = jax.random.uniform(
        kb, (channels_out,), jnp.float32, minval=-bound, maxval=bound
    )
    return weight, bias


if __name__ == "__main__":
    key = jax.random.PRNGKey(0)
    k_x1, k_p1, k_x2, k_p2, k_x3, k_p3 = jax.random.split(key, 6)

    # --- Test 1: module defaults (BN=False, NL='relu'), tiny shapes, single-block grid ---
    batch, c_in, c_out = 8, 32, 64
    x1 = jax.random.normal(k_x1, (batch, c_in), jnp.float32)
    w1, b1 = init_fc_block_params(k_p1, c_in, c_out)

    out1 = jax.block_until_ready(fc_block_forward(x1, w1, b1, NL="relu"))
    ref1 = jnp.maximum(x1 @ w1.T + b1, 0.0)
    assert out1.shape == (batch, c_out)
    assert jnp.allclose(out1, ref1, atol=2e-4, rtol=2e-4)

    # --- Test 2: leading dims, unaligned channels, forced multi-K grid (accumulator path) ---
    c_in2, c_out2 = 300, 200
    x2 = jax.random.normal(k_x2, (2, 4, c_in2), jnp.float32)
    w2, b2 = init_fc_block_params(k_p2, c_in2, c_out2)
    params2 = prepare_fc_block_params(w2, b2, max_tk=128)  # Kp=384, nk=3 -> 3D grid
    out2 = jax.block_until_ready(fc_block_forward_prepared(x2, params2, NL="gelu"))
    ref2 = jax.nn.gelu(x2 @ w2.T + b2, approximate=False)
    assert out2.shape == (2, 4, c_out2)
    assert jnp.allclose(out2, ref2, atol=2e-4, rtol=2e-4)

    # --- Test 3: weight-resident single-K path, unaligned M/N edges, megacore M split ---
    c_in3, c_out3 = 256, 96
    x3 = jax.random.normal(k_x3, (5, 8, c_in3), jnp.float32)  # M = 40
    w3, b3 = init_fc_block_params(k_p3, c_in3, c_out3)
    out3 = jax.block_until_ready(fc_block_forward(x3, w3, b3, NL="leakyrelu"))
    y3 = x3 @ w3.T + b3
    ref3 = jnp.where(y3 > 0, y3, 0.01 * y3)
    assert out3.shape == (5, 8, c_out3)
    assert jnp.allclose(out3, ref3, atol=2e-4, rtol=2e-4)

    print("KERNEL_OK")
</pallas_src>

<mosaic_0001>
module attributes {stable_mosaic.version = 11 : i64} {
  func.func @_fc_act_kernel_single(%arg0: i32, %arg1: i32, %arg2: memref<8x128xf32, #tpu.memory_space<vmem>>, %arg3: memref<128x128xf32, #tpu.memory_space<vmem>>, %arg4: memref<1x128xf32, #tpu.memory_space<vmem>>, %arg5: memref<8x128xf32, #tpu.memory_space<vmem>>) attributes {dimension_semantics = [#tpu.dimension_semantics<parallel>, #tpu.dimension_semantics<parallel>], iteration_bounds = array<i64: 1, 1>, scalar_prefetch = 0 : i64, scratch_operands = 0 : i64, tpu.core_type = #tpu.core_type<tc>, window_params = [{transform_indices = @transform_0, window_bounds = array<i64: 8, 128>}, {transform_indices = @transform_1, window_bounds = array<i64: 128, 128>}, {transform_indices = @transform_2, window_bounds = array<i64: 1, 128>}, {transform_indices = @transform_3, window_bounds = array<i64: 8, 128>}]} {
    %c0 = arith.constant 0 : index
    %c0_0 = arith.constant 0 : index
    %0 = vector.load %arg2[%c0, %c0_0] : memref<8x128xf32, #tpu.memory_space<vmem>>, vector<8x128xf32>
    %c0_1 = arith.constant 0 : index
    %c0_2 = arith.constant 0 : index
    %1 = vector.load %arg3[%c0_1, %c0_2] : memref<128x128xf32, #tpu.memory_space<vmem>>, vector<128x128xf32>
    %cst = arith.constant dense<0.000000e+00> : vector<8x128xf32>
    %2 = tpu.matmul %0, %1, %cst {dimension_numbers = #tpu.dot_dimension_numbers<[1], [0], [0], [1], [0, 0, 1, 1], [], []>} : vector<8x128xf32>, vector<128x128xf32>, vector<8x128xf32> -> vector<8x128xf32>
    %c0_3 = arith.constant 0 : index
    %c0_4 = arith.constant 0 : index
    %3 = vector.load %arg4[%c0_3, %c0_4] : memref<1x128xf32, #tpu.memory_space<vmem>>, vector<1x128xf32>
    %4 = vector.broadcast %3 : vector<1x128xf32> to vector<8x128xf32>
    %5 = arith.addf %2, %4 : vector<8x128xf32>
    %cst_5 = arith.constant 0.000000e+00 : f32
    %6 = vector.broadcast %cst_5 : f32 to vector<8x128xf32>
    %7 = arith.maximumf %5, %6 : vector<8x128xf32>
    %c0_6 = arith.constant 0 : index
    %c0_7 = arith.constant 0 : index
    %8 = vector.load %arg5[%c0_6, %c0_7] : memref<8x128xf32, #tpu.memory_space<vmem>>, vector<8x128xf32>
    tpu.vector_store %arg5[%c0_6, %c0_7], %7 {strides = array<i32>} : memref<8x128xf32, #tpu.memory_space<vmem>>, vector<8x128xf32>,
    return
  }
  func.func @transform_0(%arg0: i32, %arg1: i32) -> (i32, i32) {
    %c0_i32 = arith.constant 0 : i32
    %c0_i32_0 = arith.constant 0 : i32
    return %arg0, %c0_i32 : i32, i32
  }
  func.func @transform_1(%arg0: i32, %arg1: i32) -> (i32, i32) {
    %c0_i32 = arith.constant 0 : i32
    %c0_i32_0 = arith.constant 0 : i32
    return %c0_i32, %arg1 : i32, i32
  }
  func.func @transform_2(%arg0: i32, %arg1: i32) -> (i32, i32) {
    %c0_i32 = arith.constant 0 : i32
    %c0_i32_0 = arith.constant 0 : i32
    return %c0_i32, %arg1 : i32, i32
  }
  func.func @transform_3(%arg0: i32, %arg1: i32) -> (i32, i32) {
    %c0_i32 = arith.constant 0 : i32
    return %arg0, %arg1 : i32, i32
  }
}

</mosaic_0001>

<bundles_post_ra>
// kernel: tpu_custom_call.1
= control target key start
LH: loop header
LB: loop body
LE: loop exit
PB: predicated region body
PF: predicated region fallthrough
CT: control target
= control target key end

     0   :  { %s180_s0 = inlined_call_operand.vmem [shape: f32[8,128], index: 0, kind: input, shape index: {}]   ;;  %s181_s1 = inlined_call_operand.vmem [shape: f32[128,64], index: 1, kind: input, shape index: {}]   ;;  %s182_s2 = inlined_call_operand.vmem [shape: f32[1,64], index: 2, kind: input, shape index: {}]   ;;  %s183_s3 = inlined_call_operand.hbm [shape: f32[8,64], index: 3, kind: output, shape index: {}]  }
   0x1   :  { %v31_v0 = vld [vmem:[%s181_s1 + $0x78] sm:$0xff]  ;;  %v30_v1 = vld [vmem:[%s181_s1 + $0x70] sm:$0xff]  ;;  %v29_v2 = vld [vmem:[%s181_s1 + $0x68] sm:$0xff] }
   0x2   :  { %36 = vmatpush.msra.mxu0 %v31_v0  ;;  %v28_v3 = vld [vmem:[%s181_s1 + $0x60] sm:$0xff]  ;;  %v27_v4 = vld [vmem:[%s181_s1 + $0x58] sm:$0xff] }
   0x4   :  { %37 = vmatpush.msra.mxu0 %v30_v1 }
   0x6   :  { %38 = vmatpush.msra.mxu0 %v29_v2 }
   0x7   :  { %8 = vsyncpa [#allocation3], 0  ;;  %v26_v5 = vld [vmem:[%s181_s1 + $0x50] sm:$0xff]  ;;  %v25_v6 = vld [vmem:[%s181_s1 + $0x48] sm:$0xff]  ;;  %s102_s21 = smov [#allocation2]   ;;  %s65_s25 = sshll.u32 %s183_s3, 4  ;;  %s66_s25 = int_to_ptr.hbm [resolvable:$true] %s65_s25 }
   0x8   :  { %39 = vmatpush.msra.mxu0 %v28_v3  ;;  %v24_v7 = vld [vmem:[%s181_s1 + $0x40] sm:$0xff]  ;;  %v23_v8 = vld [vmem:[%s181_s1 + $0x38] sm:$0xff]  ;;  %v22_v9 = vld [vmem:[%s181_s1 + $0x30] sm:$0xff]  ;;  %s63_s22 = sshll.u32 %s102_s21, 4  ;;  %s64_s22 = int_to_ptr.vmem [resolvable:$true] %s63_s22 }
   0x9   :  { %v21_v10 = vld [vmem:[%s181_s1 + $0x28] sm:$0xff]  ;;  %v20_v11 = vld [vmem:[%s181_s1 + $0x20] sm:$0xff]  ;;  %v19_v12 = vld [vmem:[%s181_s1 + $0x18] sm:$0xff] }
   0xa   :  { %40 = vmatpush.msra.mxu0 %v27_v4  ;;  %v18_v13 = vld [vmem:[%s181_s1 + $0x10] sm:$0xff]  ;;  %v17_v14 = vld [vmem:[%s181_s1 + $0x8] sm:$0xff]  ;;  %v16_v15 = vld [vmem:[%s181_s1] sm:$0xff] }
   0xb   :  { %v15_v16 = vld [vmem:[%s180_s0] sm:$0xff] }
   0xc   :  { %41 = vmatpush.msra.mxu0 %v26_v5  ;;  %v75_v17 = vld [vmem:[%s182_s2] ss:$0 sm:$0xff] }
   0xe   :  { %42 = vmatpush.msra.mxu0 %v25_v6 }
  0x10   :  { %43 = vmatpush.msra.mxu0 %v24_v7 }
  0x12   :  { %44 = vmatpush.msra.mxu0 %v23_v8 }
  0x14   :  { %45 = vmatpush.msra.mxu0 %v22_v9 }
  0x16   :  { %46 = vmatpush.msra.mxu0 %v21_v10 }
  0x18   :  { %47 = vmatpush.msra.mxu0 %v20_v11 }
  0x1a   :  { %48 = vmatpush.msra.mxu0 %v19_v12 }
  0x1c   :  { %49 = vmatpush.msra.mxu0 %v18_v13 }
  0x1e   :  { %50 = vmatpush.msra.mxu0 %v17_v14 }
  0x20   :  { %51 = vmatpush.msra.mxu0 %v16_v15 }
  0x21   :  { %52 = vmatmul.f32.vlgmr.msra.gmra.mxu0 %v15_v16 }
  0x9e   :  { %v53_v18 = vpop.f32.mrf.mxu0 }
  0x9f   :  { %v54_v19 = vadd.f32 %v75_v17, %v53_v18 }
  0xa1   :  { %v56_v20 = vmax.f32 %v54_v19, 0.0 }
  0xa3   :  { %57 = vst [vmem:[#allocation2] sm:$0xff] %v56_v20 }
  0xa4   :  { %68 = dma.vmem_to_hbm [thread:$0]  %s64_s22, 128, %s66_s25, [#allocation3]  }
  0xa5   :  { %100 = dma.done.wait [#allocation3], 128  }
  0xa6   :  { %101 = vsyncadd [#allocation3], 4294967168 }
  0xa7   :  { %73 = vsyncpa [#allocation3], 1 }

</bundles_post_ra>
